<compile_context>
chip_gen: v5e
topology: v5e:2x2
jax: 0.10.0
libtpu: 0.0.40
codegen_flags: <defaults>
</compile_context>

<pallas_src>
import jax
import jax.numpy as jnp
from jax.experimental import pallas as pl
from jax.experimental.pallas import tpu as pltpu

_HIDDEN_PAD = 128   # hidden=50 padded to one full lane tile (contraction dim)


def _qnet_kernel(x_ref, w1_ref, b1_ref, w2_ref, b2_ref, o_ref):
    # Fused: (x @ W1 + b1) -> ReLU -> (h @ W2 + b2). All operands are f32.
    h = jnp.dot(x_ref[...], w1_ref[...], preferred_element_type=jnp.float32)
    h = jnp.maximum(h + b1_ref[...], 0.0)  # padded hidden lanes: 0 + 0 -> relu -> 0
    y = jnp.dot(h, w2_ref[...], preferred_element_type=jnp.float32) + b2_ref[...]
    o_ref[...] = y.astype(o_ref.dtype)     # already n_actions wide: no dead lanes


def init_params(key, obs_dim, hidden, n_actions):
    # PyTorch nn.Linear default init: U(-1/sqrt(fan_in), 1/sqrt(fan_in)).
    k1, k2, k3, k4 = jax.random.split(key, 4)
    lim1 = 1.0 / jnp.sqrt(obs_dim)
    lim2 = 1.0 / jnp.sqrt(hidden)
    w1 = jax.random.uniform(k1, (obs_dim, hidden), jnp.float32, -lim1, lim1)
    b1 = jax.random.uniform(k2, (1, hidden), jnp.float32, -lim1, lim1)
    w2 = jax.random.uniform(k3, (hidden, n_actions), jnp.float32, -lim2, lim2)
    b2 = jax.random.uniform(k4, (1, n_actions), jnp.float32, -lim2, lim2)
    return w1, b1, w2, b2


def pad_params(w1, b1, w2, b2):
    """Zero-pad the *hidden* dim once (at init time); output dim stays narrow."""
    obs_dim, hidden = w1.shape
    n_actions = w2.shape[1]
    w1p = jnp.zeros((obs_dim, _HIDDEN_PAD), jnp.float32).at[:, :hidden].set(w1)
    b1p = jnp.zeros((1, _HIDDEN_PAD), jnp.float32).at[:, :hidden].set(
        b1.reshape(1, hidden))
    w2p = jnp.zeros((_HIDDEN_PAD, n_actions), jnp.float32).at[:hidden, :].set(w2)
    b2p = b2.reshape(1, n_actions).astype(jnp.float32)
    return w1p, b1p, w2p, b2p


def qnet_forward(x, w1p, b1p, w2p, b2p, *, batch_tile=4096):
    """x: [B, obs_dim] f32 -> [B, n_actions] f32 (padded params from pad_params)."""
    B, obs_dim = x.shape
    n_actions = w2p.shape[1]
    assert batch_tile % 8 == 0, "batch_tile must satisfy the sublane (8) rule"

    if B <= batch_tile:
        # Whole problem is a single block: no grid, no pipelining machinery,
        # everything resident in VMEM. Output is written at its real width.
        return pl.pallas_call(
            _qnet_kernel,
            out_shape=jax.ShapeDtypeStruct((B, n_actions), jnp.float32),
            in_specs=[pl.BlockSpec(memory_space=pltpu.MemorySpace.VMEM)] * 5,
            out_specs=pl.BlockSpec(memory_space=pltpu.MemorySpace.VMEM),
        )(x, w1p, b1p, w2p, b2p)

    # Grid path (B > batch_tile => n_tiles >= 2, so v7x's two TensorCores both
    # get work under the "parallel" semantic; no-op on single-TC v5e/v6e).
    # Ragged final block handled by Pallas masking: no jnp.pad / extra HBM pass.
    n_tiles = pl.cdiv(B, batch_tile)
    return pl.pallas_call(
        _qnet_kernel,
        out_shape=jax.ShapeDtypeStruct((B, n_actions), jnp.float32),
        grid=(n_tiles,),
        in_specs=[
            # x / out tiled over batch only.
            pl.BlockSpec((batch_tile, obs_dim), lambda i: (i, 0)),
            # Weights/biases: constant block index -> fetched once, VMEM-resident.
            pl.BlockSpec((obs_dim, _HIDDEN_PAD), lambda i: (0, 0)),
            pl.BlockSpec((1, _HIDDEN_PAD), lambda i: (0, 0)),
            pl.BlockSpec((_HIDDEN_PAD, n_actions), lambda i: (0, 0)),
            pl.BlockSpec((1, n_actions), lambda i: (0, 0)),
        ],
        # Last block dim == full array dim (n_actions) -> legal narrow block;
        # masked vst is irrelevant here since the store is hidden under DMA.
        out_specs=pl.BlockSpec((batch_tile, n_actions), lambda i: (i, 0)),
        compiler_params=pltpu.CompilerParams(
            dimension_semantics=("parallel",),
        ),
    )(x, w1p, b1p, w2p, b2p)


if __name__ == "__main__":
    # Synthetic env dims (CartPole-like): obs_dim=4, n_actions=2.
    obs_dim, hidden, n_actions = 4, 50, 2
    batch = 8

    key = jax.random.PRNGKey(0)
    kx, kp = jax.random.split(key)
    x = jax.random.normal(kx, (batch, obs_dim), dtype=jnp.float32)
    w1, b1, w2, b2 = init_params(kp, obs_dim, hidden, n_actions)
    w1p, b1p, w2p, b2p = pad_params(w1, b1, w2, b2)

    # Small-batch (no-grid, fully VMEM-resident) path.
    out = qnet_forward(x, w1p, b1p, w2p, b2p)
    jax.block_until_ready(out)
    ref = jnp.maximum(x @ w1 + b1, 0.0) @ w2 + b2
    assert out.shape == (batch, n_actions)
    assert jnp.allclose(out, ref, atol=1e-5, rtol=1e-5)

    # Batch-tiled ("parallel" grid, resident weights) path at still-small
    # shapes, including a ragged final block (40 rows, tile 16 -> 3 tiles).
    x_big = jax.random.normal(jax.random.PRNGKey(1), (40, obs_dim), dtype=jnp.float32)
    out_big = qnet_forward(x_big, w1p, b1p, w2p, b2p, batch_tile=16)
    jax.block_until_ready(out_big)
    ref_big = jnp.maximum(x_big @ w1 + b1, 0.0) @ w2 + b2
    assert out_big.shape == (40, n_actions)
    assert jnp.allclose(out_big, ref_big, atol=1e-5, rtol=1e-5)

    print("KERNEL_OK")
</pallas_src>

<mosaic_0001>
module attributes {stable_mosaic.version = 11 : i64} {
  func.func @_qnet_kernel(%arg0: memref<8x4xf32, #tpu.memory_space<vmem>>, %arg1: memref<4x128xf32, #tpu.memory_space<vmem>>, %arg2: memref<1x128xf32, #tpu.memory_space<vmem>>, %arg3: memref<128x2xf32, #tpu.memory_space<vmem>>, %arg4: memref<1x2xf32, #tpu.memory_space<vmem>>, %arg5: memref<8x2xf32, #tpu.memory_space<vmem>>) attributes {dimension_semantics = [], scalar_prefetch = 0 : i64, scratch_operands = 0 : i64, tpu.core_type = #tpu.core_type<tc>} {
    %c0 = arith.constant 0 : index
    %c0_0 = arith.constant 0 : index
    %0 = vector.load %arg0[%c0, %c0_0] : memref<8x4xf32, #tpu.memory_space<vmem>>, vector<8x4xf32>
    %c0_1 = arith.constant 0 : index
    %c0_2 = arith.constant 0 : index
    %1 = vector.load %arg1[%c0_1, %c0_2] : memref<4x128xf32, #tpu.memory_space<vmem>>, vector<4x128xf32>
    %cst = arith.constant dense<0.000000e+00> : vector<8x128xf32>
    %2 = tpu.matmul %0, %1, %cst {dimension_numbers = #tpu.dot_dimension_numbers<[1], [0], [0], [1], [0, 0, 1, 1], [], []>} : vector<8x4xf32>, vector<4x128xf32>, vector<8x128xf32> -> vector<8x128xf32>
    %c0_3 = arith.constant 0 : index
    %c0_4 = arith.constant 0 : index
    %3 = vector.load %arg2[%c0_3, %c0_4] : memref<1x128xf32, #tpu.memory_space<vmem>>, vector<1x128xf32>
    %4 = vector.broadcast %3 : vector<1x128xf32> to vector<8x128xf32>
    %5 = arith.addf %2, %4 : vector<8x128xf32>
    %cst_5 = arith.constant 0.000000e+00 : f32
    %6 = vector.broadcast %cst_5 : f32 to vector<8x128xf32>
    %7 = arith.maximumf %5, %6 : vector<8x128xf32>
    %c0_6 = arith.constant 0 : index
    %c0_7 = arith.constant 0 : index
    %8 = vector.load %arg3[%c0_6, %c0_7] : memref<128x2xf32, #tpu.memory_space<vmem>>, vector<128x2xf32>
    %cst_8 = arith.constant dense<0.000000e+00> : vector<8x2xf32>
    %9 = tpu.matmul %7, %8, %cst_8 {dimension_numbers = #tpu.dot_dimension_numbers<[1], [0], [0], [1], [0, 0, 1, 1], [], []>} : vector<8x128xf32>, vector<128x2xf32>, vector<8x2xf32> -> vector<8x2xf32>
    %c0_9 = arith.constant 0 : index
    %c0_10 = arith.constant 0 : index
    %10 = vector.load %arg4[%c0_9, %c0_10] : memref<1x2xf32, #tpu.memory_space<vmem>>, vector<1x2xf32>
    %11 = vector.broadcast %10 : vector<1x2xf32> to vector<8x2xf32>
    %12 = arith.addf %9, %11 : vector<8x2xf32>
    %c0_11 = arith.constant 0 : index
    %c0_12 = arith.constant 0 : index
    %13 = vector.load %arg5[%c0_11, %c0_12] : memref<8x2xf32, #tpu.memory_space<vmem>>, vector<8x2xf32>
    tpu.vector_store %arg5[%c0_11, %c0_12], %12 {strides = array<i32>} : memref<8x2xf32, #tpu.memory_space<vmem>>, vector<8x2xf32>,
    return
  }
}

</mosaic_0001>

<bundles_post_ra>
// kernel: tpu_custom_call.1
= control target key start
LH: loop header
LB: loop body
LE: loop exit
PB: predicated region body
PF: predicated region fallthrough
CT: control target
= control target key end

     0   :  { %vm30_vm0 = vcmask 1043456   ;;  %vm26_vm1 = vcmask 31744   ;;  %vm95_vm2 = vcmask 15360   ;;  %s198_s1 = inlined_call_operand.vmem [shape: f32[4,128], index: 1, kind: input, shape index: {}]   ;;  %s199_s0 = inlined_call_operand.vmem [shape: f32[8,4], index: 0, kind: input, shape index: {}]   ;;  %s200_s3 = inlined_call_operand.vmem [shape: f32[128,2], index: 3, kind: input, shape index: {}]   ;;  %s201_s2 = inlined_call_operand.vmem [shape: f32[1,128], index: 2, kind: input, shape index: {}]   ;;  %s202_s4 = inlined_call_operand.vmem [shape: f32[1,2], index: 4, kind: input, shape index: {}]   ;;  %s203_s5 = inlined_call_operand.vmem [shape: f32[8,2], index: 5, kind: output, shape index: {}]  }
   0x1   :  { %v21_v0 = vld [vmem:[%s198_s1] sm:$0xf]  ;;  %v70_v2 = vld [vmem:[%s200_s3 + $0x78] sm:$0xff]  ;;  %v69_v3 = vld [vmem:[%s200_s3 + $0x70] sm:$0xff] }
   0x2   :  { %v20_v1 = vld [vmem:[%s199_s0] sm:$0xff]  ;;  %101 = vmatpush.msk.msra.mxu0 %vm30_vm0, %v21_v0  ;;  %75 = vmatpush.msra.mxu1 %v70_v2  ;;  %v68_v4 = vld [vmem:[%s200_s3 + $0x68] sm:$0xff]  ;;  %v66_v6 = vld [vmem:[%s200_s3 + $0x58] sm:$0xff] }
   0x3   :  { %102 = vmatmul.msk.f32.vlgmr.msra.gmra.mxu0 %vm26_vm1, %v20_v1  ;;  %v67_v5 = vld [vmem:[%s200_s3 + $0x60] sm:$0xff]  ;;  %v65_v7 = vld [vmem:[%s200_s3 + $0x50] sm:$0xff]  ;;  %v64_v8 = vld [vmem:[%s200_s3 + $0x48] sm:$0xff] }
   0x4   :  { %76 = vmatpush.msra.mxu1 %v69_v3  ;;  %v63_v9 = vld [vmem:[%s200_s3 + $0x40] sm:$0xff]  ;;  %v62_v10 = vld [vmem:[%s200_s3 + $0x38] sm:$0xff]  ;;  %v61_v11 = vld [vmem:[%s200_s3 + $0x30] sm:$0xff] }
   0x5   :  { %v60_v12 = vld [vmem:[%s200_s3 + $0x28] sm:$0xff]  ;;  %v59_v13 = vld [vmem:[%s200_s3 + $0x20] sm:$0xff]  ;;  %v58_v14 = vld [vmem:[%s200_s3 + $0x18] sm:$0xff] }
   0x6   :  { %77 = vmatpush.msra.mxu1 %v68_v4  ;;  %v57_v15 = vld [vmem:[%s200_s3 + $0x10] sm:$0xff]  ;;  %v56_v16 = vld [vmem:[%s200_s3 + $0x8] sm:$0xff]  ;;  %v55_v17 = vld [vmem:[%s200_s3] sm:$0xff] }
   0x7   :  { %v103_v18 = vld [vmem:[%s201_s2] ss:$0 sm:$0xff] }
   0x8   :  { %78 = vmatpush.msra.mxu1 %v67_v5  ;;  %v104_v22 = vld [vmem:[%s202_s4] ss:$0 sm:$0xff] }
   0xa   :  { %79 = vmatpush.msra.mxu1 %v66_v6 }
   0xc   :  { %80 = vmatpush.msra.mxu1 %v65_v7 }
   0xe   :  { %81 = vmatpush.msra.mxu1 %v64_v8 }
  0x10   :  { %82 = vmatpush.msra.mxu1 %v63_v9 }
  0x12   :  { %83 = vmatpush.msra.mxu1 %v62_v10 }
  0x14   :  { %84 = vmatpush.msra.mxu1 %v61_v11 }
  0x16   :  { %85 = vmatpush.msra.mxu1 %v60_v12 }
  0x18   :  { %86 = vmatpush.msra.mxu1 %v59_v13 }
  0x1a   :  { %87 = vmatpush.msra.mxu1 %v58_v14 }
  0x1c   :  { %88 = vmatpush.msra.mxu1 %v57_v15 }
  0x1e   :  { %89 = vmatpush.msra.mxu1 %v56_v16 }
  0x20   :  { %90 = vmatpush.msra.mxu1 %v55_v17 }
  0x80   :  { %v51_v19 = vpop.f32.mrf.mxu0 }
  0x81   :  { %v52_v20 = vadd.f32 %v103_v18, %v51_v19 }
  0x83   :  { %v54_v21 = vmax.f32 %v52_v20, 0.0 }
  0x85   :  { %91 = vmatmul.f32.vlgmr.msra.gmra.mxu1 %v54_v21 }
 0x102   :  { %v92_v23 = vpop.f32.mrf.mxu1 }
 0x103   :  { %v93_v24 = vadd.f32 %v104_v22, %v92_v23 }
 0x105   :  { %96 = vst.msk [vmem:[%s203_s5] sm:$0xff] %vm95_vm2, %v93_v24 }

</bundles_post_ra>
